<compile_context>
chip_gen: v6e
topology: v6e:2x2x1
jax: 0.10.0
libtpu: 0.0.40
codegen_flags: <defaults>
</compile_context>

<pallas_src>
import math
import functools

import jax
import jax.numpy as jnp
from jax.experimental import pallas as pl
from jax.experimental.pallas import tpu as pltpu

LANE = 128      # vreg lane width: hidden dims are padded to a multiple of this
SUBLANE = 8     # vreg sublane width: batch tiles are a multiple of this


def _round_up(n, m):
    return (n + m - 1) // m * m


def _default_compute_dtype():
    """bf16 dot operands on bf16-native MXUs (v6e/v7x), f32 otherwise (v5e)."""
    try:
        kind = jax.devices()[0].device_kind.lower()
    except Exception:  # pragma: no cover - defensive
        return jnp.float32
    if any(v in kind for v in ("v2", "v3", "v4", "v5")):
        return jnp.float32
    return jnp.bfloat16


# --------------------------------------------------------------------------- #
# Kernel
# --------------------------------------------------------------------------- #
def _mlp_kernel(x_ref, *refs, num_layers, compute_dtype):
    # refs = (w0, b0, w1, b1, ..., w_L, b_L, out_ref)
    out_ref = refs[-1]
    prm = refs[:-1]

    h = x_ref[...].astype(jnp.float32)
    for li in range(num_layers):
        w = prm[2 * li][...]          # (K_pad, N_pad) in compute dtype
        b = prm[2 * li + 1][...]      # (1, N_pad) f32
        h = jnp.dot(h.astype(compute_dtype), w.astype(compute_dtype),
                    preferred_element_type=jnp.float32) + b
        if li < num_layers - 1:
            # ELU(alpha=1) in f32.  exp goes to the EUP (its own bundle slot);
            # the min() keeps the discarded branch finite (safe-where pattern).
            h = jnp.where(h > 0, h, jnp.exp(jnp.minimum(h, 0.0)) - 1.0)
    out_ref[...] = h.astype(out_ref.dtype)


# --------------------------------------------------------------------------- #
# One-time parameter preparation (hoisted out of the per-call path)
# --------------------------------------------------------------------------- #
def prepare_mlp_params(params, *, compute_dtype=None):
    """params: list of (W, b), W shaped (in, out), b shaped (1, out).

    Pads hidden feature dims to the 128-lane width (d_in and d_out stay
    unpadded) and casts weights to the MXU compute dtype.  Call once; reuse
    the result across every mlp_forward call (e.g. every ODE solver step)."""
    if compute_dtype is None:
        compute_dtype = _default_compute_dtype()
    num_layers = len(params)
    dims = [params[0][0].shape[0]] + [w.shape[1] for w, _ in params]
    # keep input/output dims unpadded; pad intermediate dims to LANE
    pdims = [dims[0]] + [_round_up(d, LANE) for d in dims[1:-1]] + [dims[-1]]

    flat = []
    for li, (w, b) in enumerate(params):
        pw = jnp.zeros((pdims[li], pdims[li + 1]), jnp.float32)
        pw = pw.at[: w.shape[0], : w.shape[1]].set(w)
        pb = jnp.zeros((1, pdims[li + 1]), jnp.float32)
        pb = pb.at[:, : b.shape[1]].set(b)
        flat.append(pw.astype(compute_dtype))   # weights in compute dtype
        flat.append(pb)                         # biases stay f32 (f32 accumulate)
    return {
        "flat": tuple(flat),
        "pdims": tuple(pdims),
        "num_layers": num_layers,
        "compute_dtype": compute_dtype,
        "d_in": dims[0],
        "d_out": dims[-1],
    }


# --------------------------------------------------------------------------- #
# Forward
# --------------------------------------------------------------------------- #
def mlp_forward(x, t, prepared, *, tile_batch=2048):
    """x: (batch, d_in) f32.  t: unused (API parity with the PyTorch module).
    prepared: output of prepare_mlp_params."""
    del t  # unused in the PyTorch forward as well
    num_layers = prepared["num_layers"]
    pdims = prepared["pdims"]
    d_in = prepared["d_in"]
    d_out = prepared["d_out"]
    compute_dtype = prepared["compute_dtype"]
    flat = prepared["flat"]

    batch, x_d_in = x.shape
    assert x_d_in == d_in, f"x feature dim {x_d_in} != expected {d_in}"

    # ---- batch tiling: large tiles (amortize ~0.35us/grid-step), but aim for
    # >= 2 tiles when batch allows so both v7x TensorCores get work. ----------
    tb = _round_up(min(tile_batch, _round_up(batch, SUBLANE)), SUBLANE)
    if batch > SUBLANE:
        half = _round_up(_round_up(batch, SUBLANE) // 2, SUBLANE)
        tb = min(tb, max(half, SUBLANE))
    padded_batch = _round_up(batch, tb)

    if padded_batch != batch:
        xp = jnp.pad(x, ((0, padded_batch - batch), (0, 0)))
    else:
        xp = x

    grid = (padded_batch // tb,)

    # x streamed per tile; weights/biases full-array blocks with constant
    # index_maps -> DMA'd once, VMEM-resident across all batch tiles.
    in_specs = [pl.BlockSpec((tb, d_in), lambda i: (i, 0))]
    for li in range(num_layers):
        in_specs.append(pl.BlockSpec((pdims[li], pdims[li + 1]), lambda i: (0, 0)))
        in_specs.append(pl.BlockSpec((1, pdims[li + 1]), lambda i: (0, 0)))
    out_spec = pl.BlockSpec((tb, d_out), lambda i: (i, 0))

    kernel = functools.partial(_mlp_kernel, num_layers=num_layers,
                               compute_dtype=compute_dtype)

    out = pl.pallas_call(
        kernel,
        out_shape=jax.ShapeDtypeStruct((padded_batch, d_out), jnp.float32),
        grid=grid,
        in_specs=in_specs,
        out_specs=out_spec,
        compiler_params=pltpu.CompilerParams(
            dimension_semantics=("parallel",),   # shard batch tiles across TCs
            vmem_limit_bytes=32 << 20,           # explicit, portable to v7x
        ),
    )(xp, *flat)

    return out[:batch] if padded_batch != batch else out


# --------------------------------------------------------------------------- #
# Init matching the PyTorch module (weights stored transposed: (in, out))
# --------------------------------------------------------------------------- #
def init_mlp_params(key, d_in, d_out, hidden_layers=(32,)):
    """Matches the custom init in NeuralODE/models.py:
       hidden layer i weight ~ U(+-sqrt(1/layer_dims[i+1]))   (fan_out bound,
       as written in the PyTorch module), output weight ~ U(+-sqrt(1/d_out)),
       biases keep nn.Linear's default U(+-1/sqrt(fan_in))."""
    layer_dims = [d_in] + list(hidden_layers)
    params = []
    for i in range(len(layer_dims) - 1):
        fan_in, fan_out = layer_dims[i], layer_dims[i + 1]
        key, kw, kb = jax.random.split(key, 3)
        wb = math.sqrt(1.0 / fan_out)
        w = jax.random.uniform(kw, (fan_in, fan_out), jnp.float32, -wb, wb)
        bb = 1.0 / math.sqrt(fan_in)
        b = jax.random.uniform(kb, (1, fan_out), jnp.float32, -bb, bb)
        params.append((w, b))
    # output layer
    fan_in = layer_dims[-1]
    key, kw, kb = jax.random.split(key, 3)
    wb = math.sqrt(1.0 / d_out)
    w = jax.random.uniform(kw, (fan_in, d_out), jnp.float32, -wb, wb)
    bb = 1.0 / math.sqrt(fan_in)
    b = jax.random.uniform(kb, (1, d_out), jnp.float32, -bb, bb)
    params.append((w, b))
    return params


def mlp_reference(x, params):
    h = x
    for i, (w, b) in enumerate(params):
        h = h @ w + b
        if i < len(params) - 1:
            h = jnp.where(h > 0, h, jnp.exp(jnp.minimum(h, 0.0)) - 1.0)
    return h


if __name__ == "__main__":
    key = jax.random.PRNGKey(0)
    d_in, d_out, hidden = 4, 4, (32,)
    batch = 8

    kx, kp, kt = jax.random.split(key, 3)
    x = jax.random.normal(kx, (batch, d_in), jnp.float32)
    t = jax.random.normal(kt, (batch, 1), jnp.float32)   # unused, API parity
    params = init_mlp_params(kp, d_in, d_out, hidden)

    prepared = prepare_mlp_params(params)      # one-time padding / dtype cast
    bf16 = prepared["compute_dtype"] == jnp.bfloat16
    atol = rtol = 5e-2 if bf16 else 1e-5       # f32 reference; bf16 MXU operands

    out = jax.block_until_ready(mlp_forward(x, t, prepared))
    ref = mlp_reference(x, params)
    assert out.shape == (batch, d_out)
    assert jnp.allclose(out, ref, atol=atol, rtol=rtol), "mismatch vs reference"

    # exercise the multi-tile (grid > 1) + batch-padding path
    batch2 = 200
    x2 = jax.random.normal(jax.random.PRNGKey(1), (batch2, d_in), jnp.float32)
    out2 = jax.block_until_ready(mlp_forward(x2, None, prepared, tile_batch=64))
    ref2 = mlp_reference(x2, params)
    assert out2.shape == (batch2, d_out)
    assert jnp.allclose(out2, ref2, atol=atol, rtol=rtol), "mismatch vs reference (tiled)"

    print("KERNEL_OK")
</pallas_src>

<mosaic_0001>
module attributes {stable_mosaic.version = 11 : i64} {
  func.func @_mlp_kernel(%arg0: i32, %arg1: memref<8x4xf32, #tpu.memory_space<vmem>>, %arg2: memref<4x128xbf16, #tpu.memory_space<vmem>>, %arg3: memref<1x128xf32, #tpu.memory_space<vmem>>, %arg4: memref<128x4xbf16, #tpu.memory_space<vmem>>, %arg5: memref<1x4xf32, #tpu.memory_space<vmem>>, %arg6: memref<8x4xf32, #tpu.memory_space<vmem>>) attributes {dimension_semantics = [#tpu.dimension_semantics<parallel>], iteration_bounds = array<i64: 1>, scalar_prefetch = 0 : i64, scratch_operands = 0 : i64, tpu.core_type = #tpu.core_type<tc>, window_params = [{transform_indices = @transform_0, window_bounds = array<i64: 8, 4>}, {pipeline_mode = #tpu.pipeline_mode<synchronous>, transform_indices = @transform_1, window_bounds = array<i64: 4, 128>}, {pipeline_mode = #tpu.pipeline_mode<synchronous>, transform_indices = @transform_2, window_bounds = array<i64: 1, 128>}, {pipeline_mode = #tpu.pipeline_mode<synchronous>, transform_indices = @transform_3, window_bounds = array<i64: 128, 4>}, {pipeline_mode = #tpu.pipeline_mode<synchronous>, transform_indices = @transform_4, window_bounds = array<i64: 1, 4>}, {transform_indices = @transform_5, window_bounds = array<i64: 8, 4>}]} {
    %c0 = arith.constant 0 : index
    %c0_0 = arith.constant 0 : index
    %0 = vector.load %arg1[%c0, %c0_0] : memref<8x4xf32, #tpu.memory_space<vmem>>, vector<8x4xf32>
    %c0_1 = arith.constant 0 : index
    %c0_2 = arith.constant 0 : index
    %1 = vector.load %arg2[%c0_1, %c0_2] : memref<4x128xbf16, #tpu.memory_space<vmem>>, vector<4x128xbf16>
    %c0_3 = arith.constant 0 : index
    %c0_4 = arith.constant 0 : index
    %2 = vector.load %arg3[%c0_3, %c0_4] : memref<1x128xf32, #tpu.memory_space<vmem>>, vector<1x128xf32>
    %3 = arith.truncf %0 : vector<8x4xf32> to vector<8x4xbf16>
    %cst = arith.constant dense<0.000000e+00> : vector<8x128xf32>
    %4 = tpu.matmul %3, %1, %cst {dimension_numbers = #tpu.dot_dimension_numbers<[1], [0], [0], [1], [0, 0, 1, 1], [], []>} : vector<8x4xbf16>, vector<4x128xbf16>, vector<8x128xf32> -> vector<8x128xf32>
    %5 = vector.broadcast %2 : vector<1x128xf32> to vector<8x128xf32>
    %6 = arith.addf %4, %5 : vector<8x128xf32>
    %cst_5 = arith.constant 0.000000e+00 : f32
    %7 = vector.broadcast %cst_5 : f32 to vector<8x128xf32>
    %8 = arith.cmpf ogt, %6, %7 : vector<8x128xf32>
    %cst_6 = arith.constant 0.000000e+00 : f32
    %9 = vector.broadcast %cst_6 : f32 to vector<8x128xf32>
    %10 = arith.minimumf %6, %9 : vector<8x128xf32>
    %11 = math.exp %10 : vector<8x128xf32>
    %cst_7 = arith.constant 1.000000e+00 : f32
    %12 = vector.broadcast %cst_7 : f32 to vector<8x128xf32>
    %13 = arith.subf %11, %12 : vector<8x128xf32>
    %14 = arith.select %8, %6, %13 : vector<8x128xi1>, vector<8x128xf32>
    %c0_8 = arith.constant 0 : index
    %c0_9 = arith.constant 0 : index
    %15 = vector.load %arg4[%c0_8, %c0_9] : memref<128x4xbf16, #tpu.memory_space<vmem>>, vector<128x4xbf16>
    %c0_10 = arith.constant 0 : index
    %c0_11 = arith.constant 0 : index
    %16 = vector.load %arg5[%c0_10, %c0_11] : memref<1x4xf32, #tpu.memory_space<vmem>>, vector<1x4xf32>
    %17 = arith.truncf %14 : vector<8x128xf32> to vector<8x128xbf16>
    %cst_12 = arith.constant dense<0.000000e+00> : vector<8x4xf32>
    %18 = tpu.matmul %17, %15, %cst_12 {dimension_numbers = #tpu.dot_dimension_numbers<[1], [0], [0], [1], [0, 0, 1, 1], [], []>} : vector<8x128xbf16>, vector<128x4xbf16>, vector<8x4xf32> -> vector<8x4xf32>
    %19 = vector.broadcast %16 : vector<1x4xf32> to vector<8x4xf32>
    %20 = arith.addf %18, %19 : vector<8x4xf32>
    %c0_13 = arith.constant 0 : index
    %c0_14 = arith.constant 0 : index
    %21 = vector.load %arg6[%c0_13, %c0_14] : memref<8x4xf32, #tpu.memory_space<vmem>>, vector<8x4xf32>
    tpu.vector_store %arg6[%c0_13, %c0_14], %20 {strides = array<i32>} : memref<8x4xf32, #tpu.memory_space<vmem>>, vector<8x4xf32>,
    return
  }
  func.func @transform_0(%arg0: i32) -> (i32, i32) {
    %c0_i32 = arith.constant 0 : i32
    %c0_i32_0 = arith.constant 0 : i32
    return %arg0, %c0_i32 : i32, i32
  }
  func.func @transform_1(%arg0: i32) -> (i32, i32) {
    %c0_i32 = arith.constant 0 : i32
    %c0_i32_0 = arith.constant 0 : i32
    %c0_i32_1 = arith.constant 0 : i32
    return %c0_i32, %c0_i32_0 : i32, i32
  }
  func.func @transform_2(%arg0: i32) -> (i32, i32) {
    %c0_i32 = arith.constant 0 : i32
    %c0_i32_0 = arith.constant 0 : i32
    %c0_i32_1 = arith.constant 0 : i32
    return %c0_i32, %c0_i32_0 : i32, i32
  }
  func.func @transform_3(%arg0: i32) -> (i32, i32) {
    %c0_i32 = arith.constant 0 : i32
    %c0_i32_0 = arith.constant 0 : i32
    %c0_i32_1 = arith.constant 0 : i32
    return %c0_i32, %c0_i32_0 : i32, i32
  }
  func.func @transform_4(%arg0: i32) -> (i32, i32) {
    %c0_i32 = arith.constant 0 : i32
    %c0_i32_0 = arith.constant 0 : i32
    %c0_i32_1 = arith.constant 0 : i32
    return %c0_i32, %c0_i32_0 : i32, i32
  }
  func.func @transform_5(%arg0: i32) -> (i32, i32) {
    %c0_i32 = arith.constant 0 : i32
    %c0_i32_0 = arith.constant 0 : i32
    return %arg0, %c0_i32 : i32, i32
  }
}

</mosaic_0001>

<bundles_post_ra>
// kernel: tpu_custom_call.1
= control target key start
LH: loop header
LB: loop body
LE: loop exit
PB: predicated region body
PF: predicated region fallthrough
CT: control target
= control target key end

     0   :  { %vm35_vm0 = vcmask 1041408   ;;  %v263_v0 = vmov 0.0   ;;  %vm264_vm1 = vmmov 0   ;;  %vm31_vm2 = vcmask 31744   ;;  %s336_s1 = inlined_call_operand.vmem [shape: bf16[4,128], index: 1, kind: input, shape index: {}]   ;;  %s337_s0 = inlined_call_operand.vmem [shape: f32[8,4], index: 0, kind: input, shape index: {}]   ;;  %s338_s3 = inlined_call_operand.vmem [shape: bf16[128,4], index: 3, kind: input, shape index: {}]   ;;  %s339_s2 = inlined_call_operand.vmem [shape: f32[1,128], index: 2, kind: input, shape index: {}]   ;;  %s340_s4 = inlined_call_operand.vmem [shape: f32[1,4], index: 4, kind: input, shape index: {}]   ;;  %s341_s5 = inlined_call_operand.vmem [shape: f32[8,4], index: 5, kind: output, shape index: {}]  }
   0x1   :  { %225 = vmatprep.subr.bf16.mxu0 %v263_v0  ;;  %v22_v1 = vld [vmem:[%s336_s1] sm:$0x3]  ;;  %227 = vmatprep.mubr.msk.bf16.mxu0 %vm264_vm1, %v263_v0  ;;  %v253_v5 = vld [vmem:[%s338_s3 + $0x38] sm:$0xff]   ;;  %v254_v6 = vld [vmem:[%s338_s3 + $0x30] sm:$0xff]  }
   0x2   :  { %v21_v2 = vld [vmem:[%s337_s0] sm:$0xff]  ;;  %v37_v3 = vsel %vm35_vm0, %v22_v1, 0  ;;  %231 = vmatprep.subr.bf16.mxu1 %v263_v0  ;;  %247 = vmatprep.mubr.msk.bf16.mxu1 %vm264_vm1, %v263_v0  ;;  %v255_v7 = vld [vmem:[%s338_s3 + $0x28] sm:$0xff]   ;;  %v257_v9 = vld [vmem:[%s338_s3 + $0x18] sm:$0xff]  }
   0x3   :  { %v24_v4 = vpack.c.bf16 %v21_v2, %v21_v2  ;;  %226 = vmatpush3.bf16.msra.mxu0 %v37_v3  ;;  %232 = vmatpush3.bf16.msra.mxu1 %v253_v5  ;;  %v256_v8 = vld [vmem:[%s338_s3 + $0x20] sm:$0xff]   ;;  %v258_v10 = vld [vmem:[%s338_s3 + $0x10] sm:$0xff]   ;;  %v259_v11 = vld [vmem:[%s338_s3 + $0x8] sm:$0xff]  }
   0x4   :  { %233 = vmatprep.subr.bf16.mxu1 %v263_v0  ;;  %v260_v12 = vld [vmem:[%s338_s3] sm:$0xff]  }
   0x5   :  { %v202_v13 = vld [vmem:[%s339_s2] ss:$0 sm:$0xff] }
   0x6   :  { %228 = vmatmul.mubr.msk.bf16.vlgmr.msra.gmra.mxu0 %vm31_vm2, %v24_v4  ;;  %v205_v25 = vld [vmem:[%s340_s4] ss:$0 sm:$0xff] }
   0x7   :  { %234 = vmatpush3.bf16.msra.mxu1 %v254_v6 }
   0x8   :  { %235 = vmatprep.subr.bf16.mxu1 %v263_v0 }
   0xb   :  { %236 = vmatpush3.bf16.msra.mxu1 %v255_v7 }
   0xc   :  { %237 = vmatprep.subr.bf16.mxu1 %v263_v0 }
   0xf   :  { %238 = vmatpush3.bf16.msra.mxu1 %v256_v8 }
  0x10   :  { %239 = vmatprep.subr.bf16.mxu1 %v263_v0 }
  0x13   :  { %240 = vmatpush3.bf16.msra.mxu1 %v257_v9 }
  0x14   :  { %241 = vmatprep.subr.bf16.mxu1 %v263_v0 }
  0x17   :  { %242 = vmatpush3.bf16.msra.mxu1 %v258_v10 }
  0x18   :  { %243 = vmatprep.subr.bf16.mxu1 %v263_v0 }
  0x1b   :  { %244 = vmatpush3.bf16.msra.mxu1 %v259_v11 }
  0x1c   :  { %245 = vmatprep.subr.bf16.mxu1 %v263_v0 }
  0x1f   :  { %246 = vmatpush3.bf16.msra.mxu1 %v260_v12 }
  0xc6   :  { %v73_v14 = vpop.f32.mrf.mxu0 }
  0xc7   :  { %v74_v15 = vadd.f32 %v202_v13, %v73_v14 }
  0xc8   :  { %v229_v16 = vpop.f32.mrf.mxu0 }
  0xc9   :  { %v80_v17 = vmin.f32 %v74_v15, 0.0  ;;  %vm79_vm3 = vcmp.gt.f32.partialorder %v74_v15, 0.0 }
  0xca   :  { %v76_v18 = vpop.f32.mrf.mxu0 }
  0xcb   :  { %v81_v19 = vmul.f32 1.442695, %v80_v17 }
  0xcc   :  { %v230_v20 = vpop.f32.mrf.mxu0 }
  0xcd   :  { %261 = vpow2.f32 %v81_v19 }
  0xda   :  { %v262_v21 = vpop.eup %261 }
  0xdb   :  { %v204_v22 = vadd.f32 -1.0, %v262_v21 }
  0xdd   :  { %v84_v23 = vsel %vm79_vm3, %v74_v15, %v204_v22 }
  0xde   :  { %v102_v24 = vpack.c.bf16 %v84_v23, %v84_v23 }
  0xe0   :  { %248 = vmatmul.mubr.bf16.vlgmr.msra.gmra.mxu1 %v102_v24 }
 0x1a0   :  { %v191_v26 = vpop.f32.mrf.mxu1 }
 0x1a1   :  { %v192_v27 = vadd.f32 %v205_v25, %v191_v26 }
 0x1a2   :  { %v249_v28 = vpop.f32.mrf.mxu1 }
 0x1a3   :  { %197 = vst.msk [vmem:[%s341_s5] sm:$0xff] %vm31_vm2, %v192_v27 }
 0x1a4   :  { %v194_v29 = vpop.f32.mrf.mxu1 }
 0x1a6   :  { %v250_v30 = vpop.f32.mrf.mxu1 }

</bundles_post_ra>
